<compile_context>
chip_gen: v7x
topology: tpu7x:2x2x1
jax: 0.10.0
libtpu: 0.0.40
codegen_flags: <defaults>
</compile_context>

<pallas_src>
import functools
from typing import NamedTuple

import jax
import jax.numpy as jnp
from jax.experimental import pallas as pl
from jax.experimental.pallas import tpu as pltpu


class Normal(NamedTuple):
    """Minimal stand-in for torch.distributions.Normal(loc, scale)."""
    loc: jax.Array
    scale: jax.Array


def _round_up(x: int, m: int) -> int:
    return ((x + m - 1) // m) * m


def _encoder_kernel(x_ref, w1_ref, b1_ref, w2_ref, b2_ref, out_ref, *, d_latent):
    """One batch tile: (x @ W1 + b1).relu() @ W2 + b2, exp() on log_var lanes.

    x, W1, W2 are bf16 (MXU); accumulation and the epilogue are f32.
    Output is a single lane-dense (TB, d_out_pad) f32 block.
    """
    x = x_ref[...]                                                  # (TB, Din_p) bf16
    h = jnp.dot(x, w1_ref[...], preferred_element_type=jnp.float32) + b1_ref[...]
    h = jnp.maximum(h, 0.0)                                         # ReLU in f32
    out = jnp.dot(h.astype(jnp.bfloat16), w2_ref[...],
                  preferred_element_type=jnp.float32) + b2_ref[...]  # (TB, Dout_p) f32
    # Lanes [0, d_latent) are mu (identity); lanes >= d_latent are log_var -> exp.
    lane = jax.lax.broadcasted_iota(jnp.int32, out.shape, 1)
    out_ref[...] = jnp.where(lane < d_latent, out, jnp.exp(out))


def encoder_forward(x, w1, b1, w2, b2, d_latent, *, tb=256):
    """Pallas-backed forward pass equivalent to Encoder.forward."""
    B = x.shape[0]
    x_flat = x.reshape(B, -1)                      # == x.view(B, -1)
    d_in = x_flat.shape[1]
    d_hidden = w1.shape[1]
    d_out = w2.shape[1]                            # 2 * d_latent

    # Pad feature dims to full 128-lane tiles; pad batch to the tile size.
    d_in_p = _round_up(d_in, 128)
    d_hid_p = _round_up(d_hidden, 128)
    d_out_p = _round_up(d_out, 128)
    TB = min(tb, _round_up(B, 16))                 # multiple of 16 (bf16 sublanes)
    B_p = _round_up(B, TB)
    n_tiles = B_p // TB

    # bf16 inputs/weights for the MXU; zero padding keeps the math exact for
    # the real rows/columns (ReLU(0)=0, zero W2 rows contribute nothing).
    x_p = jnp.zeros((B_p, d_in_p), jnp.bfloat16).at[:B, :d_in].set(
        x_flat.astype(jnp.bfloat16))
    w1_p = jnp.zeros((d_in_p, d_hid_p), jnp.bfloat16).at[:d_in, :d_hidden].set(
        w1.astype(jnp.bfloat16))
    b1_p = jnp.zeros((1, d_hid_p), jnp.float32).at[0, :d_hidden].set(
        b1.astype(jnp.float32))
    w2_p = jnp.zeros((d_hid_p, d_out_p), jnp.bfloat16).at[:d_hidden, :d_out].set(
        w2.astype(jnp.bfloat16))
    b2_p = jnp.zeros((1, d_out_p), jnp.float32).at[0, :d_out].set(
        b2.astype(jnp.float32))

    # Generation-portable VMEM budget (double-buffered x/out + resident weights).
    est_bytes = (2 * TB * d_in_p * 2      # x tiles, bf16, double-buffered
                 + d_in_p * d_hid_p * 2   # W1 resident, bf16
                 + d_hid_p * d_out_p * 2  # W2 resident, bf16
                 + (d_hid_p + d_out_p) * 4 * 2
                 + 2 * TB * d_out_p * 4)  # output tiles, f32, double-buffered
    vmem_limit = int(min(48 << 20, max(2 * est_bytes, 16 << 20)))

    kernel = functools.partial(_encoder_kernel, d_latent=d_latent)

    out = pl.pallas_call(
        kernel,
        out_shape=jax.ShapeDtypeStruct((B_p, d_out_p), jnp.float32),
        grid=(n_tiles,),
        in_specs=[
            pl.BlockSpec((TB, d_in_p), lambda i: (i, 0)),     # x: streamed per tile
            pl.BlockSpec((d_in_p, d_hid_p), lambda i: (0, 0)),  # W1: VMEM-resident
            pl.BlockSpec((1, d_hid_p), lambda i: (0, 0)),       # b1
            pl.BlockSpec((d_hid_p, d_out_p), lambda i: (0, 0)),  # W2: VMEM-resident
            pl.BlockSpec((1, d_out_p), lambda i: (0, 0)),        # b2
        ],
        out_specs=pl.BlockSpec((TB, d_out_p), lambda i: (i, 0)),  # lane-dense output
        compiler_params=pltpu.CompilerParams(
            dimension_semantics=("parallel",),
            vmem_limit_bytes=vmem_limit,
        ),
    )(x_p, w1_p, b1_p, w2_p, b2_p)

    mu = out[:B, :d_latent]
    scale = out[:B, d_latent:d_out]                # exp(log_var), done in-kernel
    return Normal(loc=mu, scale=scale)


def init_params(key, d_in, d_hidden, d_latent):
    """encoder = Linear(d_in, d_hidden) -> ReLU -> Linear(d_hidden, 2*d_latent).

    Weights stored transposed vs torch ((in, out)) so the kernel does x @ W.
    """
    k1, k2, k3, k4 = jax.random.split(key, 4)
    w1 = jax.random.normal(k1, (d_in, d_hidden), jnp.float32) * (1.0 / jnp.sqrt(d_in))
    b1 = jax.random.normal(k2, (d_hidden,), jnp.float32) * 0.01
    w2 = jax.random.normal(k3, (d_hidden, 2 * d_latent), jnp.float32) * (1.0 / jnp.sqrt(d_hidden))
    b2 = jax.random.normal(k4, (2 * d_latent,), jnp.float32) * 0.01
    return w1, b1, w2, b2


def reference_forward(x, w1, b1, w2, b2, d_latent):
    """Pure-JAX f32 reference for correctness checking."""
    x_flat = x.reshape(x.shape[0], -1).astype(jnp.float32)
    h = jnp.maximum(x_flat @ w1 + b1, 0.0)
    out = h @ w2 + b2
    return out[:, :d_latent], jnp.exp(out[:, d_latent:])


if __name__ == "__main__":
    # Small shapes consistent with the module's forward (image-like NCHW input).
    B, C, H, W = 2, 4, 16, 16
    d_in = C * H * W          # 1024
    d_hidden = 32
    d_latent = 8

    key = jax.random.PRNGKey(0)
    kx, kp = jax.random.split(key)
    x = jax.random.normal(kx, (B, C, H, W), jnp.float32)
    w1, b1, w2, b2 = init_params(kp, d_in, d_hidden, d_latent)

    dist_out = encoder_forward(x, w1, b1, w2, b2, d_latent)
    jax.block_until_ready(dist_out.loc)
    jax.block_until_ready(dist_out.scale)

    # Verify against the pure-JAX f32 reference (kernel matmuls run in bf16
    # with f32 accumulation, so allow bf16-level tolerance).
    mu_ref, scale_ref = reference_forward(x, w1, b1, w2, b2, d_latent)
    assert dist_out.loc.shape == (B, d_latent)
    assert dist_out.scale.shape == (B, d_latent)
    assert jnp.allclose(dist_out.loc, mu_ref, atol=5e-2, rtol=5e-2), (
        jnp.max(jnp.abs(dist_out.loc - mu_ref)))
    assert jnp.allclose(dist_out.scale, scale_ref, atol=5e-2, rtol=5e-2), (
        jnp.max(jnp.abs(dist_out.scale - scale_ref)))

    print("KERNEL_OK")
</pallas_src>

<mosaic_0001>
module attributes {stable_mosaic.version = 11 : i64} {
  func.func @_encoder_kernel(%arg0: i32, %arg1: memref<16x1024xbf16, #tpu.memory_space<vmem>>, %arg2: memref<1024x128xbf16, #tpu.memory_space<vmem>>, %arg3: memref<1x128xf32, #tpu.memory_space<vmem>>, %arg4: memref<128x128xbf16, #tpu.memory_space<vmem>>, %arg5: memref<1x128xf32, #tpu.memory_space<vmem>>, %arg6: memref<16x128xf32, #tpu.memory_space<vmem>>) attributes {dimension_semantics = [#tpu.dimension_semantics<parallel>], iteration_bounds = array<i64: 1>, scalar_prefetch = 0 : i64, scratch_operands = 0 : i64, tpu.core_type = #tpu.core_type<tc>, window_params = [{transform_indices = @transform_0, window_bounds = array<i64: 16, 1024>}, {pipeline_mode = #tpu.pipeline_mode<synchronous>, transform_indices = @transform_1, window_bounds = array<i64: 1024, 128>}, {pipeline_mode = #tpu.pipeline_mode<synchronous>, transform_indices = @transform_2, window_bounds = array<i64: 1, 128>}, {pipeline_mode = #tpu.pipeline_mode<synchronous>, transform_indices = @transform_3, window_bounds = array<i64: 128, 128>}, {pipeline_mode = #tpu.pipeline_mode<synchronous>, transform_indices = @transform_4, window_bounds = array<i64: 1, 128>}, {transform_indices = @transform_5, window_bounds = array<i64: 16, 128>}]} {
    %c0 = arith.constant 0 : index
    %c0_0 = arith.constant 0 : index
    %0 = vector.load %arg1[%c0, %c0_0] : memref<16x1024xbf16, #tpu.memory_space<vmem>>, vector<16x1024xbf16>
    %c0_1 = arith.constant 0 : index
    %c0_2 = arith.constant 0 : index
    %1 = vector.load %arg2[%c0_1, %c0_2] : memref<1024x128xbf16, #tpu.memory_space<vmem>>, vector<1024x128xbf16>
    %cst = arith.constant dense<0.000000e+00> : vector<16x128xf32>
    %2 = tpu.matmul %0, %1, %cst {dimension_numbers = #tpu.dot_dimension_numbers<[1], [0], [0], [1], [0, 0, 1, 1], [], []>} : vector<16x1024xbf16>, vector<1024x128xbf16>, vector<16x128xf32> -> vector<16x128xf32>
    %c0_3 = arith.constant 0 : index
    %c0_4 = arith.constant 0 : index
    %3 = vector.load %arg3[%c0_3, %c0_4] : memref<1x128xf32, #tpu.memory_space<vmem>>, vector<1x128xf32>
    %4 = vector.broadcast %3 : vector<1x128xf32> to vector<16x128xf32>
    %5 = arith.addf %2, %4 : vector<16x128xf32>
    %cst_5 = arith.constant 0.000000e+00 : f32
    %6 = vector.broadcast %cst_5 : f32 to vector<16x128xf32>
    %7 = arith.maximumf %5, %6 : vector<16x128xf32>
    %8 = arith.truncf %7 : vector<16x128xf32> to vector<16x128xbf16>
    %c0_6 = arith.constant 0 : index
    %c0_7 = arith.constant 0 : index
    %9 = vector.load %arg4[%c0_6, %c0_7] : memref<128x128xbf16, #tpu.memory_space<vmem>>, vector<128x128xbf16>
    %cst_8 = arith.constant dense<0.000000e+00> : vector<16x128xf32>
    %10 = tpu.matmul %8, %9, %cst_8 {dimension_numbers = #tpu.dot_dimension_numbers<[1], [0], [0], [1], [0, 0, 1, 1], [], []>} : vector<16x128xbf16>, vector<128x128xbf16>, vector<16x128xf32> -> vector<16x128xf32>
    %c0_9 = arith.constant 0 : index
    %c0_10 = arith.constant 0 : index
    %11 = vector.load %arg5[%c0_9, %c0_10] : memref<1x128xf32, #tpu.memory_space<vmem>>, vector<1x128xf32>
    %12 = vector.broadcast %11 : vector<1x128xf32> to vector<16x128xf32>
    %13 = arith.addf %10, %12 : vector<16x128xf32>
    %14 = tpu.iota {dimensions = array<i32: 1>} : vector<16x128xi32>
    %c8_i32 = arith.constant 8 : i32
    %15 = vector.broadcast %c8_i32 : i32 to vector<16x128xi32>
    %16 = arith.cmpi slt, %14, %15 : vector<16x128xi32>
    %17 = math.exp %13 : vector<16x128xf32>
    %18 = arith.select %16, %13, %17 : vector<16x128xi1>, vector<16x128xf32>
    %c0_11 = arith.constant 0 : index
    %c0_12 = arith.constant 0 : index
    %19 = vector.load %arg6[%c0_11, %c0_12] : memref<16x128xf32, #tpu.memory_space<vmem>>, vector<16x128xf32>
    tpu.vector_store %arg6[%c0_11, %c0_12], %18 {strides = array<i32>} : memref<16x128xf32, #tpu.memory_space<vmem>>, vector<16x128xf32>,
    return
  }
  func.func @transform_0(%arg0: i32) -> (i32, i32) {
    %c0_i32 = arith.constant 0 : i32
    %c0_i32_0 = arith.constant 0 : i32
    return %arg0, %c0_i32 : i32, i32
  }
  func.func @transform_1(%arg0: i32) -> (i32, i32) {
    %c0_i32 = arith.constant 0 : i32
    %c0_i32_0 = arith.constant 0 : i32
    %c0_i32_1 = arith.constant 0 : i32
    return %c0_i32, %c0_i32_0 : i32, i32
  }
  func.func @transform_2(%arg0: i32) -> (i32, i32) {
    %c0_i32 = arith.constant 0 : i32
    %c0_i32_0 = arith.constant 0 : i32
    %c0_i32_1 = arith.constant 0 : i32
    return %c0_i32, %c0_i32_0 : i32, i32
  }
  func.func @transform_3(%arg0: i32) -> (i32, i32) {
    %c0_i32 = arith.constant 0 : i32
    %c0_i32_0 = arith.constant 0 : i32
    %c0_i32_1 = arith.constant 0 : i32
    return %c0_i32, %c0_i32_0 : i32, i32
  }
  func.func @transform_4(%arg0: i32) -> (i32, i32) {
    %c0_i32 = arith.constant 0 : i32
    %c0_i32_0 = arith.constant 0 : i32
    %c0_i32_1 = arith.constant 0 : i32
    return %c0_i32, %c0_i32_0 : i32, i32
  }
  func.func @transform_5(%arg0: i32) -> (i32, i32) {
    %c0_i32 = arith.constant 0 : i32
    %c0_i32_0 = arith.constant 0 : i32
    return %arg0, %c0_i32 : i32, i32
  }
}

</mosaic_0001>

<bundles_post_ra>
// kernel: tpu_custom_call.1
= control target key start
LH: loop header
LB: loop body
LE: loop exit
PB: predicated region body
PF: predicated region fallthrough
CT: control target
= control target key end

     0   :  { %10 = vsyncpa [#allocation3], 0  ;;  %s1421_s0 = inlined_call_operand.hbm [shape: bf16[16,1024], index: 0, kind: input, shape index: {}]   ;;  %s1422_s1 = inlined_call_operand.hbm [shape: bf16[1024,128], index: 1, kind: input, shape index: {}]   ;;  %s1423_s2 = inlined_call_operand.vmem [shape: f32[1,128], index: 2, kind: input, shape index: {}]   ;;  %s1424_s3 = inlined_call_operand.hbm [shape: bf16[128,128], index: 3, kind: input, shape index: {}]   ;;  %s1425_s4 = inlined_call_operand.vmem [shape: f32[1,128], index: 4, kind: input, shape index: {}]   ;;  %s1426_s5 = inlined_call_operand.hbm [shape: f32[16,128], index: 5, kind: output, shape index: {}]  }
   0x1   :  { %11 = vsyncpa [#allocation6], 0 }
   0x2   :  { %12 = vsyncpa [#allocation4], 0  ;;  %s1319_s18 = smov [#allocation5]   ;;  %s1225_s22 = scalar_lea.hbm %s1422_s1, 8192 }
   0x3   :  { %s30_s19 = sshll.u32 %s1319_s18, 4  ;;  %p1226_p0 = scmp.ne.s32.totalorder %s1422_s1, %s1225_s22  ;;  %s31_s19 = int_to_ptr.vmem [resolvable:$true] %s30_s19 }
   0x4   :  { %p1229_p1 = scmp.lt.u32.totalorder %s1225_s22, %s1422_s1 }
   0x6   :  { %p1231_p2 = pnand %p1229_p1, %p1226_p0 }
   0x8   :  { %1234 = shalt.err (!%p1231_p2)
}
   0x9   :  { %s1235_s27 = scalar_lea.vmem %s31_s19, 8192  ;;  %p1240_p4 = scmp.lt.s32.totalorder %s31_s19, %s31_s19 }
   0xa   :  { %p1236_p3 = scmp.ne.s32.totalorder %s31_s19, %s1235_s27  ;;  %p1241_p5 = scmp.lt.s32.totalorder %s1235_s27, %s1235_s27 }
   0xc   :  { %p1242_p6 = por %p1241_p5, %p1240_p4 }
   0xe   :  { %p1243_p7 = pnand %p1242_p6, %p1236_p3 }
  0x10   :  { %1246 = shalt.err (!%p1243_p7)
}
  0x11   :  { %s1320_s28 = smov 64   ;;  %s1321_s29 = smov 4  }
  0x12   :  { %36 = dma.hbm_to_vmem [thread:$0]  %s1422_s1, 8192, %s31_s19, [#allocation6], %s1320_s28, %s1320_s28, %s1321_s29  }
  0x13   :  { %s1322_s7 = smov [#allocation2]   ;;  %s1247_s11 = scalar_lea.hbm %s1421_s0, 1024 }
  0x14   :  { %s18_s8 = sshll.u32 %s1322_s7, 4  ;;  %p1248_p8 = scmp.ne.s32.totalorder %s1421_s0, %s1247_s11  ;;  %s19_s8 = int_to_ptr.vmem [resolvable:$true] %s18_s8 }
  0x15   :  { %p1251_p9 = scmp.lt.u32.totalorder %s1247_s11, %s1421_s0 }
  0x17   :  { %p1253_p10 = pnand %p1251_p9, %p1248_p8 }
  0x19   :  { %1256 = shalt.err (!%p1253_p10)
}
  0x1a   :  { %s1257_s16 = scalar_lea.vmem %s19_s8, 1024  ;;  %p1262_p12 = scmp.lt.s32.totalorder %s19_s8, %s19_s8 }
  0x1b   :  { %p1258_p11 = scmp.ne.s32.totalorder %s19_s8, %s1257_s16  ;;  %p1263_p13 = scmp.lt.s32.totalorder %s1257_s16, %s1257_s16 }
  0x1d   :  { %p1264_p0 = por %p1263_p13, %p1262_p12 }
  0x1f   :  { %p1265_p1 = pnand %p1264_p0, %p1258_p11 }
  0x21   :  { %1268 = shalt.err (!%p1265_p1)
}
  0x22   :  { %s1323_s1 = smov 512   ;;  %s1324_s17 = smov 32  }
  0x23   :  { %24 = dma.hbm_to_vmem [thread:$0]  %s1421_s0, 1024, %s19_s8, [#allocation3], %s1323_s1, %s1323_s1, %s1324_s17  }
  0x24   :  { %s1325_s20 = smov [#allocation7]   ;;  %s1269_s24 = scalar_lea.hbm %s1424_s3, 1024 }
  0x25   :  { %s44_s21 = sshll.u32 %s1325_s20, 4  ;;  %p1270_p2 = scmp.ne.s32.totalorder %s1424_s3, %s1269_s24  ;;  %s45_s21 = int_to_ptr.vmem [resolvable:$true] %s44_s21 }
  0x26   :  { %p1273_p3 = scmp.lt.u32.totalorder %s1269_s24, %s1424_s3 }
  0x28   :  { %p1275_p4 = pnand %p1273_p3, %p1270_p2 }
  0x2a   :  { %1278 = shalt.err (!%p1275_p4)
}
  0x2b   :  { %s1279_s6 = scalar_lea.vmem %s45_s21, 1024  ;;  %p1284_p6 = scmp.lt.s32.totalorder %s45_s21, %s45_s21 }
  0x2c   :  { %p1280_p5 = scmp.ne.s32.totalorder %s45_s21, %s1279_s6  ;;  %p1285_p7 = scmp.lt.s32.totalorder %s1279_s6, %s1279_s6 }
  0x2e   :  { %p1286_p8 = por %p1285_p7, %p1284_p6 }
  0x30   :  { %p1287_p9 = pnand %p1286_p8, %p1280_p5 }
  0x32   :  { %1290 = shalt.err (!%p1287_p9)
}
  0x33   :  { %50 = dma.hbm_to_vmem [thread:$0]  %s1424_s3, 1024, %s45_s21, [#allocation6], %s1320_s28, %s1320_s28, %s1321_s29  }
  0x34   :  { %1313 = dma.done.wait [#allocation3], 1024  }
  0x35   :  { %1314 = vsyncadd [#allocation3], 4294966272 }
  0x36   :  { %1315 = dma.done.wait [#allocation6], 9216  }
  0x37   :  { %1316 = vsyncadd [#allocation6], 4294958080  ;;  %v1149_v0 = vld [vmem:[#allocation5 + $0x40] sm:$0xff]   ;;  %v1153_v4 = vld [vmem:[#allocation5 + $0x48] sm:$0xff]   ;;  %vm1327_vm0 = vmmov 0   ;;  %s1328_s8 = smov [#allocation8]  }
  0x38   :  { %v1150_v1 = vld [vmem:[#allocation5 + $0xc0] sm:$0xff]   ;;  %1020 = vmatprep.subr.bf16.mxu0 %v1149_v0  ;;  %v1154_v5 = vld [vmem:[#allocation5 + $0xc8] sm:$0xff]   ;;  %v1157_v8 = vld [vmem:[#allocation5 + $0x50] sm:$0xff]   ;;  %s925_s9 = sshll.u32 %s1328_s8, 4  ;;  %s926_s9 = int_to_ptr.vmem [resolvable:$true] %s925_s9 }
  0x39   :  { %v1151_v2 = vld [vmem:[#allocation5] sm:$0xff]   ;;  %1042 = vmatprep.subr.bf16.mxu1 %v1150_v1  ;;  %v1155_v6 = vld [vmem:[#allocation5 + $0x8] sm:$0xff]   ;;  %v1158_v9 = vld [vmem:[#allocation5 + $0xd0] sm:$0xff]   ;;  %p1296_p11 = scmp.lt.s32.totalorder %s926_s9, %s926_s9 }
  0x3a   :  { %v1152_v3 = vld [vmem:[#allocation5 + $0x80] sm:$0xff]   ;;  %1021 = vmatpush3.bf16.msra.mxu0 %v1151_v2  ;;  %v1156_v7 = vld [vmem:[#allocation5 + $0x88] sm:$0xff]   ;;  %v1159_v10 = vld [vmem:[#allocation5 + $0x10] sm:$0xff]  }
  0x3b   :  { %1043 = vmatpush3.bf16.msra.mxu1 %v1152_v3  ;;  %1022 = vmatprep.subr.bf16.mxu0 %v1153_v4  ;;  %v1160_v11 = vld [vmem:[#allocation5 + $0x90] sm:$0xff]   ;;  %v1161_v12 = vld [vmem:[#allocation5 + $0x58] sm:$0xff]   ;;  %v1165_v16 = vld [vmem:[#allocation5 + $0x60] sm:$0xff]  }
  0x3c   :  { %1044 = vmatprep.subr.bf16.mxu1 %v1154_v5  ;;  %v1162_v13 = vld [vmem:[#allocation5 + $0xd8] sm:$0xff]   ;;  %v1166_v17 = vld [vmem:[#allocation5 + $0xe0] sm:$0xff]   ;;  %v1169_v20 = vld [vmem:[#allocation5 + $0x68] sm:$0xff]  }
  0x3d   :  { %v1163_v14 = vld [vmem:[#allocation5 + $0x18] sm:$0xff]   ;;  %v1167_v18 = vld [vmem:[#allocation5 + $0x20] sm:$0xff]   ;;  %v1170_v21 = vld [vmem:[#allocation5 + $0xe8] sm:$0xff]  }
  0x3e   :  { %1023 = vmatpush3.bf16.msra.mxu0 %v1155_v6  ;;  %v1164_v15 = vld [vmem:[#allocation5 + $0x98] sm:$0xff]   ;;  %v1168_v19 = vld [vmem:[#allocation5 + $0xa0] sm:$0xff]   ;;  %v1171_v22 = vld [vmem:[#allocation5 + $0x28] sm:$0xff]  }
  0x3f   :  { %1045 = vmatpush3.bf16.msra.mxu1 %v1156_v7  ;;  %1024 = vmatprep.subr.bf16.mxu0 %v1157_v8  ;;  %v1172_v23 = vld [vmem:[#allocation5 + $0xa8] sm:$0xff]   ;;  %v1173_v24 = vld [vmem:[#allocation5 + $0x70] sm:$0xff]   ;;  %v1177_v28 = vld [vmem:[#allocation5 + $0x78] sm:$0xff]  }
  0x40   :  { %1046 = vmatprep.subr.bf16.mxu1 %v1158_v9  ;;  %v1174_v25 = vld [vmem:[#allocation5 + $0xf0] sm:$0xff]   ;;  %v1178_v29 = vld [vmem:[#allocation5 + $0xf8] sm:$0xff]   ;;  %v63_v32 = vld [vmem:[#allocation2] sm:$0xff] }
  0x41   :  { %v1175_v26 = vld [vmem:[#allocation5 + $0x30] sm:$0xff]   ;;  %v1179_v30 = vld [vmem:[#allocation5 + $0x38] sm:$0xff]   ;;  %v67_v33 = vld [vmem:[#allocation2 + $0x20] sm:$0xff] }
  0x42   :  { %1025 = vmatpush3.bf16.msra.mxu0 %v1159_v10  ;;  %v1176_v27 = vld [vmem:[#allocation5 + $0xb0] sm:$0xff]   ;;  %v1180_v31 = vld [vmem:[#allocation5 + $0xb8] sm:$0xff]   ;;  %v64_v34 = vld [vmem:[#allocation2 + $0x8] sm:$0xff]  ;;  %v939_v35 = vcombine.low %v63_v32, %v67_v33  ;;  %v940_v36 = vcombine.high %v63_v32, %v67_v33 }
  0x43   :  { %1047 = vmatpush3.bf16.msra.mxu1 %v1160_v11  ;;  %1026 = vmatprep.subr.bf16.mxu0 %v1161_v12  ;;  %v68_v37 = vld [vmem:[#allocation2 + $0x28] sm:$0xff]  ;;  %v1181_v40 = vld [vmem:[#allocation5 + $0x140] sm:$0xff]   ;;  %v1189_v48 = vld [vmem:[#allocation5 + $0x150] sm:$0xff]  }
  0x44   :  { %1048 = vmatprep.subr.bf16.mxu1 %v1162_v13  ;;  %v941_v38 = vcombine.low %v64_v34, %v68_v37  ;;  %v942_v39 = vcombine.high %v64_v34, %v68_v37  ;;  %662 = vmatprep.mubr.bf16.mxu0 %v940_v36  ;;  %v1182_v41 = vld [vmem:[#allocation5 + $0x1c0] sm:$0xff]   ;;  %v1185_v44 = vld [vmem:[#allocation5 + $0x148] sm:$0xff]   ;;  %v1190_v49 = vld [vmem:[#allocation5 + $0x1d0] sm:$0xff]  }
  0x45   :  { %v1183_v42 = vld [vmem:[#allocation5 + $0x100] sm:$0xff]   ;;  %v1186_v45 = vld [vmem:[#allocation5 + $0x1c8] sm:$0xff]   ;;  %v1191_v50 = vld [vmem:[#allocation5 + $0x110] sm:$0xff]  }
  0x46   :  { %1027 = vmatpush3.bf16.msra.mxu0 %v1163_v14  ;;  %703 = vmatprep.mubr.bf16.mxu1 %v942_v39  ;;  %v1184_v43 = vld [vmem:[#allocation5 + $0x180] sm:$0xff]   ;;  %v1187_v46 = vld [vmem:[#allocation5 + $0x108] sm:$0xff]   ;;  %v1192_v51 = vld [vmem:[#allocation5 + $0x190] sm:$0xff]  }
  0x47   :  { %1049 = vmatpush3.bf16.msra.mxu1 %v1164_v15  ;;  %1028 = vmatprep.subr.bf16.mxu0 %v1165_v16  ;;  %v1188_v47 = vld [vmem:[#allocation5 + $0x188] sm:$0xff]   ;;  %v1193_v52 = vld [vmem:[#allocation5 + $0x158] sm:$0xff]   ;;  %v1197_v56 = vld [vmem:[#allocation5 + $0x160] sm:$0xff]  }
  0x48   :  { %1050 = vmatprep.subr.bf16.mxu1 %v1166_v17  ;;  %v1194_v53 = vld [vmem:[#allocation5 + $0x1d8] sm:$0xff]   ;;  %v1198_v57 = vld [vmem:[#allocation5 + $0x1e0] sm:$0xff]   ;;  %v1201_v60 = vld [vmem:[#allocation5 + $0x168] sm:$0xff]   ;;  %v1326_v17 = vmov 0.0  }
  0x49   :  { %v1195_v54 = vld [vmem:[#allocation5 + $0x118] sm:$0xff]   ;;  %v1199_v58 = vld [vmem:[#allocation5 + $0x120] sm:$0xff]   ;;  %v1202_v61 = vld [vmem:[#allocation5 + $0x1e8] sm:$0xff]  }
  0x4a   :  { %1029 = vmatpush3.bf16.msra.mxu0 %v1167_v18  ;;  %v1196_v55 = vld [vmem:[#allocation5 + $0x198] sm:$0xff]   ;;  %v1200_v59 = vld [vmem:[#allocation5 + $0x1a0] sm:$0xff]   ;;  %v1203_v62 = vld [vmem:[#allocation5 + $0x128] sm:$0xff]  }
  0x4b   :  { %1051 = vmatpush3.bf16.msra.mxu1 %v1168_v19  ;;  %1030 = vmatprep.subr.bf16.mxu0 %v1169_v20  ;;  %v1204_v63 = vld [vmem:[#allocation5 + $0x1a8] sm:$0xff]   ;;  %v1205_v0 = vld [vmem:[#allocation5 + $0x170] sm:$0xff]   ;;  %v1209_v4 = vld [vmem:[#allocation5 + $0x178] sm:$0xff]  }
  0x4c   :  { %1052 = vmatprep.subr.bf16.mxu1 %v1170_v21  ;;  %v1206_v1 = vld [vmem:[#allocation5 + $0x1f0] sm:$0xff]   ;;  %v1210_v5 = vld [vmem:[#allocation5 + $0x1f8] sm:$0xff]   ;;  %v1213_v16 = vld [vmem:[#allocation7] sm:$0xff]  }
  0x4d   :  { %v1207_v2 = vld [vmem:[#allocation5 + $0x130] sm:$0xff]   ;;  %v1211_v6 = vld [vmem:[#allocation5 + $0x138] sm:$0xff]   ;;  %v1214_v18 = vld [vmem:[#allocation7 + $0x8] sm:$0xff]  }
  0x4e   :  { %1031 = vmatpush3.bf16.msra.mxu0 %v1171_v22  ;;  %v1208_v3 = vld [vmem:[#allocation5 + $0x1b0] sm:$0xff]   ;;  %v1212_v7 = vld [vmem:[#allocation5 + $0x1b8] sm:$0xff]   ;;  %v1217_v21 = vld [vmem:[#allocation7 + $0x20] sm:$0xff]  }
  0x4f   :  { %1053 = vmatpush3.bf16.msra.mxu1 %v1172_v23  ;;  %1032 = vmatprep.subr.bf16.mxu0 %v1173_v24  ;;  %v65_v8 = vld [vmem:[#allocation2 + $0x10] sm:$0xff]  ;;  %v66_v12 = vld [vmem:[#allocation2 + $0x18] sm:$0xff]  ;;  %v1218_v22 = vld [vmem:[#allocation7 + $0x28] sm:$0xff]  }
  0x50   :  { %1054 = vmatprep.subr.bf16.mxu1 %v1174_v25  ;;  %v69_v9 = vld [vmem:[#allocation2 + $0x30] sm:$0xff]  ;;  %v70_v13 = vld [vmem:[#allocation2 + $0x38] sm:$0xff] }
  0x51   :  { %v943_v10 = vcombine.low %v65_v8, %v69_v9  ;;  %v944_v11 = vcombine.high %v65_v8, %v69_v9  ;;  %v945_v14 = vcombine.low %v66_v12, %v70_v13  ;;  %v946_v15 = vcombine.high %v66_v12, %v70_v13  ;;  %v1215_v19 = vld [vmem:[#allocation7 + $0x10] sm:$0xff]   ;;  %v1216_v20 = vld [vmem:[#allocation7 + $0x18] sm:$0xff]  }
  0x52   :  { %1033 = vmatpush3.bf16.msra.mxu0 %v1175_v26  ;;  %v1219_v23 = vld [vmem:[#allocation7 + $0x30] sm:$0xff]   ;;  %v1220_v24 = vld [vmem:[#allocation7 + $0x38] sm:$0xff]  }
  0x53   :  { %1055 = vmatpush3.bf16.msra.mxu1 %v1176_v27  ;;  %1034 = vmatprep.subr.bf16.mxu0 %v1177_v28  ;;  %v938_v27 = vld [vmem:[%s1423_s2] ss:$0 sm:$0xff] }
  0x54   :  { %1056 = vmatprep.subr.bf16.mxu1 %v1178_v29 }
  0x56   :  { %1035 = vmatpush3.bf16.msra.mxu0 %v1179_v30 }
  0x57   :  { %1057 = vmatpush3.bf16.msra.mxu1 %v1180_v31  ;;  %1064 = vmatprep.subr.bf16.mxu0 %v1181_v40 }
  0x58   :  { %1086 = vmatprep.subr.bf16.mxu1 %v1182_v41 }
  0x59   :  { %663 = vmatmul.mubr.bf16.vlgmr.msra.gmra.mrb[0].mxu0 %v939_v35 }
  0x5a   :  { %704 = vmatmul.mubr.bf16.vlgmr.msra.gmra.mrb[0].mxu1 %v941_v38  ;;  %1065 = vmatpush3.bf16.msra.mxu0 %v1183_v42 }
  0x5b   :  { %1087 = vmatpush3.bf16.msra.mxu1 %v1184_v43  ;;  %1066 = vmatprep.subr.bf16.mxu0 %v1185_v44 }
  0x5c   :  { %1088 = vmatprep.subr.bf16.mxu1 %v1186_v45  ;;  %744 = vmatprep.mubr.bf16.mxu0 %v944_v11 }
  0x5d   :  { %785 = vmatprep.mubr.bf16.mxu1 %v946_v15 }
  0x5e   :  { %1067 = vmatpush3.bf16.msra.mxu0 %v1187_v46 }
  0x5f   :  { %1089 = vmatpush3.bf16.msra.mxu1 %v1188_v47  ;;  %1068 = vmatprep.subr.bf16.mxu0 %v1189_v48 }
  0x60   :  { %1090 = vmatprep.subr.bf16.mxu1 %v1190_v49 }
  0x62   :  { %1069 = vmatpush3.bf16.msra.mxu0 %v1191_v50 }
  0x63   :  { %1091 = vmatpush3.bf16.msra.mxu1 %v1192_v51  ;;  %1070 = vmatprep.subr.bf16.mxu0 %v1193_v52 }
  0x64   :  { %1092 = vmatprep.subr.bf16.mxu1 %v1194_v53 }
  0x66   :  { %1071 = vmatpush3.bf16.msra.mxu0 %v1195_v54 }
  0x67   :  { %1093 = vmatpush3.bf16.msra.mxu1 %v1196_v55  ;;  %1072 = vmatprep.subr.bf16.mxu0 %v1197_v56 }
  0x68   :  { %1094 = vmatprep.subr.bf16.mxu1 %v1198_v57 }
  0x6a   :  { %1073 = vmatpush3.bf16.msra.mxu0 %v1199_v58 }
  0x6b   :  { %1095 = vmatpush3.bf16.msra.mxu1 %v1200_v59  ;;  %1074 = vmatprep.subr.bf16.mxu0 %v1201_v60 }
  0x6c   :  { %1096 = vmatprep.subr.bf16.mxu1 %v1202_v61  ;;  %v1011_v61 = vld [vmem:[%s1425_s4] ss:$0 sm:$0xff]  ;;  %s1291_s4 = scalar_lea.vmem %s926_s9, 256 }
  0x6d   :  { %p1292_p10 = scmp.ne.s32.totalorder %s926_s9, %s1291_s4  ;;  %p1297_p12 = scmp.lt.s32.totalorder %s1291_s4, %s1291_s4 }
  0x6e   :  { %1075 = vmatpush3.bf16.msra.mxu0 %v1203_v62 }
  0x6f   :  { %1097 = vmatpush3.bf16.msra.mxu1 %v1204_v63  ;;  %1076 = vmatprep.subr.bf16.mxu0 %v1205_v0  ;;  %p1298_p13 = por %p1297_p12, %p1296_p11 }
  0x70   :  { %1098 = vmatprep.subr.bf16.mxu1 %v1206_v1 }
  0x71   :  { %p1299_p0 = pnand %p1298_p13, %p1292_p10 }
  0x72   :  { %1077 = vmatpush3.bf16.msra.mxu0 %v1207_v2 }
  0x73   :  { %1099 = vmatpush3.bf16.msra.mxu1 %v1208_v3  ;;  %1078 = vmatprep.subr.bf16.mxu0 %v1209_v4 }
  0x74   :  { %1100 = vmatprep.subr.bf16.mxu1 %v1210_v5  ;;  %v909_v5 = vlaneseq }
  0x76   :  { %1079 = vmatpush3.bf16.msra.mxu0 %v1211_v6 }
  0x77   :  { %1101 = vmatpush3.bf16.msra.mxu1 %v1212_v7  ;;  %1117 = vmatprep.subr.bf16.mxu0 %v1326_v17  ;;  %v910_v7 = vand.u32 127, %v909_v5 }
  0x79   :  { %745 = vmatmul.mubr.bf16.vlgmr.msra.gmra.mrb[4].mxu0 %v943_v10  ;;  %vm911_vm1 = vcmp.lt.s32.totalorder %v910_v7, 8 }
  0x7a   :  { %786 = vmatmul.mubr.bf16.vlgmr.msra.gmra.mrb[4].mxu1 %v945_v14  ;;  %1118 = vmatpush3.bf16.msra.mxu0 %v1213_v16 }
  0x7b   :  { %1119 = vmatprep.subr.bf16.mxu0 %v1326_v17  ;;  %1133 = vmatprep.mubr.msk.bf16.mxu0 %vm1327_vm0, %v1326_v17 }
  0x7e   :  { %1120 = vmatpush3.bf16.msra.mxu0 %v1214_v18 }
  0x7f   :  { %1121 = vmatprep.subr.bf16.mxu0 %v1326_v17 }
  0x82   :  { %1122 = vmatpush3.bf16.msra.mxu0 %v1215_v19 }
  0x83   :  { %1123 = vmatprep.subr.bf16.mxu0 %v1326_v17 }
  0x86   :  { %1124 = vmatpush3.bf16.msra.mxu0 %v1216_v20 }
  0x87   :  { %1125 = vmatprep.subr.bf16.mxu0 %v1326_v17 }
  0x8a   :  { %1126 = vmatpush3.bf16.msra.mxu0 %v1217_v21 }
  0x8b   :  { %1127 = vmatprep.subr.bf16.mxu0 %v1326_v17 }
  0x8e   :  { %1128 = vmatpush3.bf16.msra.mxu0 %v1218_v22 }
  0x8f   :  { %1129 = vmatprep.subr.bf16.mxu0 %v1326_v17 }
  0x92   :  { %1130 = vmatpush3.bf16.msra.mxu0 %v1219_v23 }
  0x93   :  { %1131 = vmatprep.subr.bf16.mxu0 %v1326_v17 }
  0x96   :  { %1132 = vmatpush3.bf16.msra.mxu0 %v1220_v24 }
 0x12c   :  { %v1036_v25 = vpop.f32.mrb[0].mxu0 }
 0x12d   :  { %v1058_v26 = vpop.f32.mrb[0].mxu1  ;;  %v1037_v28 = vpop.f32.mrb[1].mxu0 }
 0x12e   :  { %v1038_v29 = vadd.f32 %v1037_v28, %v1036_v25  ;;  %v1059_v30 = vpop.f32.mrb[1].mxu1  ;;  %v1039_v31 = vpop.f32.mrb[2].mxu0 }
 0x12f   :  { %v1060_v32 = vadd.f32 %v1059_v30, %v1058_v26  ;;  %v1061_v33 = vpop.f32.mrb[2].mxu1  ;;  %v1040_v34 = vpop.f32.mrb[3].mxu0 }
 0x130   :  { %v665_v35 = vadd.f32 %v1038_v29, %v938_v27  ;;  %v1041_v36 = vadd.f32 %v1040_v34, %v1039_v31  ;;  %v1062_v37 = vpop.f32.mrb[3].mxu1 }
 0x131   :  { %v1063_v38 = vadd.f32 %v1062_v37, %v1061_v33 }
 0x132   :  { %v706_v39 = vadd.f32 %v1060_v32, %v665_v35  ;;  %v668_v40 = vadd.f32 %v1041_v36, %v938_v27 }
 0x134   :  { %v709_v41 = vadd.f32 %v1063_v38, %v668_v40 }
 0x14c   :  { %v1080_v42 = vpop.f32.mrb[4].mxu0 }
 0x14d   :  { %v1102_v43 = vpop.f32.mrb[4].mxu1  ;;  %v1081_v44 = vpop.f32.mrb[5].mxu0 }
 0x14e   :  { %v1082_v45 = vadd.f32 %v1081_v44, %v1080_v42  ;;  %v1103_v46 = vpop.f32.mrb[5].mxu1  ;;  %v1083_v47 = vpop.f32.mrb[6].mxu0 }
 0x14f   :  { %v1104_v48 = vadd.f32 %v1103_v46, %v1102_v43  ;;  %v1105_v49 = vpop.f32.mrb[6].mxu1  ;;  %v1084_v50 = vpop.f32.mrb[7].mxu0 }
 0x150   :  { %v747_v51 = vadd.f32 %v1082_v45, %v706_v39  ;;  %v1085_v52 = vadd.f32 %v1084_v50, %v1083_v47  ;;  %v1106_v53 = vpop.f32.mrb[7].mxu1 }
 0x151   :  { %v1107_v54 = vadd.f32 %v1106_v53, %v1105_v49 }
 0x152   :  { %v788_v55 = vadd.f32 %v1104_v48, %v747_v51  ;;  %v750_v56 = vadd.f32 %v1085_v52, %v709_v41 }
 0x154   :  { %v791_v57 = vadd.f32 %v1107_v54, %v750_v56  ;;  %v794_v58 = vmax.f32 %v788_v55, 0.0 }
 0x156   :  { %v795_v59 = vmax.f32 %v791_v57, 0.0 }
 0x158   :  { %v796_v60 = vpack.c.bf16 %v795_v59, %v794_v58 }
 0x15a   :  { %1134 = vmatmul.mubr.bf16.vlgmr.msra.gmra.mrb[8].mxu0 %v796_v60 }
 0x22d   :  { %v902_v62 = vpop.f32.mrb[8].mxu0 }
 0x22e   :  { %v903_v63 = vadd.f32 %v1011_v61, %v902_v62  ;;  %v1135_v0 = vpop.f32.mrb[9].mxu0 }
 0x22f   :  { %v905_v1 = vpop.f32.mrb[10].mxu0 }
 0x230   :  { %v912_v2 = vmul.f32 1.442695, %v903_v63  ;;  %v906_v3 = vadd.f32 %v1011_v61, %v905_v1  ;;  %v1136_v4 = vpop.f32.mrb[11].mxu0 }
 0x232   :  { %1221 = vpow2.f32 %v912_v2  ;;  %v914_v6 = vmul.f32 1.442695, %v906_v3 }
 0x234   :  { %1223 = vpow2.f32 %v914_v6 }
 0x23c   :  { %v1222_v8 = vpop.eup %1221 }
 0x23d   :  { %v916_v9 = vsel %vm911_vm1, %v903_v63, %v1222_v8 }
 0x23e   :  { %v1224_v10 = vpop.eup %1223  ;;  %918 = vst [vmem:[#allocation8] sm:$0xff] %v916_v9 }
 0x23f   :  { %v917_v11 = vsel %vm911_vm1, %v906_v3, %v1224_v10 }
 0x240   :  { %919 = vst [vmem:[#allocation8 + $0x8] sm:$0xff] %v917_v11 }
 0x241   :  { %1302 = shalt.err (!%p1299_p0)
}
 0x242   :  { %s1303_s12 = scalar_lea.hbm %s1426_s5, 256 }
 0x243   :  { %p1304_p1 = scmp.ne.s32.totalorder %s1426_s5, %s1303_s12  ;;  %p1307_p2 = scmp.lt.u32.totalorder %s1303_s12, %s1426_s5 }
 0x245   :  { %p1309_p3 = pnand %p1307_p2, %p1304_p1 }
 0x247   :  { %1312 = shalt.err (!%p1309_p3)
}
 0x248   :  { %s1329_s1 = smov 128   ;;  %s1330_s17 = smov 8  }
 0x249   :  { %931 = dma.vmem_to_hbm [thread:$0]  %s926_s9, 256, %s1426_s5, [#allocation4], %s1329_s1, %s1329_s1, %s1330_s17  }
 0x24a   :  { %1317 = dma.done.wait [#allocation4], 256  }
 0x24b   :  { %1318 = vsyncadd [#allocation4], 4294967040 }
 0x24c   :  { %935 = vsyncpa [#allocation3], 1 }
 0x24d   :  { %936 = vsyncpa [#allocation6], 1 }
 0x24e   :  { %937 = vsyncpa [#allocation4], 1 }

</bundles_post_ra>
